<compile_context>
chip_gen: v5e
topology: v5e:2x2
jax: 0.10.0
libtpu: 0.0.40
codegen_flags: <defaults>
</compile_context>

<pallas_src>
import jax
import jax.numpy as jnp
from jax import lax
from jax.experimental import pallas as pl
from jax.experimental.pallas import tpu as pltpu


def _round_up(x, m):
    return (x + m - 1) // m * m


def _vmem_budget_bytes():
    """Generation-aware VMEM budget for the double-buffered working set."""
    try:
        cap = int(pltpu.get_tpu_info().vmem_capacity_bytes)
    except Exception:
        cap = 64 * 1024 * 1024          # conservative fallback (v7x per-TC VMEM)
    return max(min(cap // 2, 32 * 1024 * 1024), 8 * 1024 * 1024)


def _choose_tile(batch, embed_dim, topic_size, user_size, item_size):
    """Pick the batch tile TB (multiple of 128) and padded batch B_pad.

    TB is sized so the double-buffered streamed blocks plus in-kernel f32
    temporaries fit the per-generation VMEM budget, capped at 8192.  It is
    clamped so the grid has >= 2 tiles whenever the batch allows (so the
    "parallel" grid axis can shard across v7x's two TensorCores), and it always
    divides B_pad = round_up(batch, 128) so at most 127 padding rows exist.
    """
    budget = _vmem_budget_bytes()
    b128 = _round_up(max(int(batch), 1), 128)

    # Per-batch-row bytes: double-buffered streamed blocks (1-row id/out blocks
    # are sublane-padded to 8 rows in VMEM) + live f32 temporaries in the body.
    streamed = 2 * 4 * (8 + 8 + max(topic_size, 8) + 8)   # users, items, ctx^T, out
    temps = 4 * (user_size + item_size + 3 * embed_dim)   # one-hots + 3x [D, TB]
    per_row = streamed + temps
    # Resident (constant index_map) tables; assume double-buffered, worst case.
    tables = 2 * 4 * embed_dim * (user_size + item_size + topic_size)

    # NOTE: if the tables alone exceed the budget the 128-row fallback can still
    # overshoot; the compile-time vmem_limit_bytes check catches that case.
    rows = max(budget - tables, 128 * per_row) // per_row
    tb = int(min(max(rows // 128 * 128, 128), 8192, b128))
    if b128 >= 256:                       # keep >= 2 tiles for megacore sharding
        tb = min(tb, (b128 // 2) // 128 * 128)
    while b128 % tb != 0:                 # make TB divide B_pad (minimal padding)
        tb -= 128
    return tb, b128


def _mf_kernel(u_idx_ref, i_idx_ref, ctxT_ref, userT_ref, itemT_ref, topicT_ref,
               o_ref):
    """One batch tile; batch stays on the lane axis throughout.

    u_idx_ref : [1, TB] int32  user ids
    i_idx_ref : [1, TB] int32  item ids
    ctxT_ref  : [T, TB] f32    item_ctx^T
    userT_ref : [D, U]  f32    user embedding table^T (VMEM resident)
    itemT_ref : [D, I]  f32    item embedding table^T (VMEM resident)
    topicT_ref: [D, T]  f32    topic embedding^T      (VMEM resident)
    o_ref     : [1, TB] f32    predictions
    """
    f32 = jnp.float32
    d = userT_ref.shape[0]
    n_user = userT_ref.shape[1]
    n_item = itemT_ref.shape[1]
    tb = o_ref.shape[1]

    # Embedding gathers as one-hot^T matmuls on the MXU (exact row selection).
    # TODO(synk): for embedding tables too large for VMEM, replace this with a
    # manual per-row DMA gather from pl.ANY-space tables.
    oh_u = (u_idx_ref[...] ==
            lax.broadcasted_iota(jnp.int32, (n_user, tb), 0)).astype(f32)
    oh_i = (i_idx_ref[...] ==
            lax.broadcasted_iota(jnp.int32, (n_item, tb), 0)).astype(f32)

    u_t = jnp.dot(userT_ref[...], oh_u, preferred_element_type=f32)     # [D, TB]
    it_t = jnp.dot(itemT_ref[...], oh_i, preferred_element_type=f32)    # [D, TB]
    ctx_t = jnp.dot(topicT_ref[...], ctxT_ref[...],
                    preferred_element_type=f32)                         # [D, TB]

    # pred = sum_d u*ctx + sum_d it*u == sum_d u*(ctx + it).  The reduction over
    # D (the sublane axis) is a ones-vector matmul so it rides the MXU slot and
    # the [1, TB] result stores lane-dense.
    prod = u_t * (ctx_t + it_t)                                         # [D, TB]
    ones_row = jnp.ones((1, d), dtype=f32)
    o_ref[...] = jnp.dot(ones_row, prod,
                         preferred_element_type=f32).astype(o_ref.dtype)


@jax.jit
def mf_forward(users, items, item_ctx, user_emb_table, item_emb_table, topic_emb):
    """Pallas-backed forward pass of model_MF.

    users, items   : int32 [B]
    item_ctx       : f32   [B, T]
    user_emb_table : f32   [U, D]
    item_emb_table : f32   [I, D]
    topic_emb      : f32   [T, D]
    returns pred   : f32   [B]
    """
    B = users.shape[0]
    n_user, D = user_emb_table.shape
    n_item = item_emb_table.shape[0]
    T = topic_emb.shape[0]

    TB, B_pad = _choose_tile(B, D, T, n_user, n_item)
    pad = B_pad - B

    # Pad the tiny id / ctx inputs (pre-gather), never gathered activations;
    # padded ids point at row 0 and their results are sliced off at the end.
    users_p = jnp.pad(users.astype(jnp.int32), (0, pad)).reshape(1, B_pad)
    items_p = jnp.pad(items.astype(jnp.int32), (0, pad)).reshape(1, B_pad)
    ctx_T = jnp.pad(item_ctx.astype(jnp.float32), ((0, pad), (0, 0))).T  # [T, B_pad]

    user_T = user_emb_table.astype(jnp.float32).T     # [D, U]
    item_T = item_emb_table.astype(jnp.float32).T     # [D, I]
    topic_T = topic_emb.astype(jnp.float32).T         # [D, T]

    grid = (B_pad // TB,)
    bytes_accessed = B_pad * (4 + 4 + 4 * T + 4) + 4 * D * (n_user + n_item + T)
    flops = 2 * B_pad * D * (n_user + n_item + T + 1) + 2 * B_pad * D

    out = pl.pallas_call(
        _mf_kernel,
        out_shape=jax.ShapeDtypeStruct((1, B_pad), jnp.float32),
        grid_spec=pltpu.PrefetchScalarGridSpec(
            num_scalar_prefetch=0,
            grid=grid,
            in_specs=[
                pl.BlockSpec((1, TB), lambda i: (0, i)),       # user ids
                pl.BlockSpec((1, TB), lambda i: (0, i)),       # item ids
                pl.BlockSpec((T, TB), lambda i: (0, i)),       # item_ctx^T tile
                pl.BlockSpec((D, n_user), lambda i: (0, 0)),   # user table^T (resident)
                pl.BlockSpec((D, n_item), lambda i: (0, 0)),   # item table^T (resident)
                pl.BlockSpec((D, T), lambda i: (0, 0)),        # topic^T (resident)
            ],
            out_specs=pl.BlockSpec((1, TB), lambda i: (0, i)),
        ),
        compiler_params=pltpu.CompilerParams(
            dimension_semantics=("parallel",),   # shard batch tiles across TCs (v7x)
            vmem_limit_bytes=32 * 1024 * 1024,
        ),
        cost_estimate=pl.CostEstimate(
            flops=flops, transcendentals=0, bytes_accessed=bytes_accessed),
    )(users_p, items_p, ctx_T, user_T, item_T, topic_T)

    return out[0, :B]


def reference_forward(users, items, item_ctx, user_emb_table, item_emb_table, topic_emb):
    eu = user_emb_table[users]
    ei = item_emb_table[items]
    ec = item_ctx @ topic_emb
    return jnp.sum(eu * ec, axis=1) + jnp.sum(ei * eu, axis=1)


if __name__ == "__main__":
    # Small, deterministic setup consistent with model_MF.__init__ shapes.
    embedding_dim = 32
    topic_size = 8
    user_size = 16
    item_size = 16
    batch = 8

    key = jax.random.PRNGKey(0)
    k_u, k_i, k_t, k_users, k_items, k_ctx = jax.random.split(key, 6)

    # Parameter init (deterministic, synthetic — no checkpoint load).
    user_emb_table = jax.random.normal(k_u, (user_size, embedding_dim), jnp.float32)
    item_emb_table = jax.random.normal(k_i, (item_size, embedding_dim), jnp.float32)
    topic_emb = jax.random.uniform(k_t, (topic_size, embedding_dim), jnp.float32)

    # Inputs.
    users = jax.random.randint(k_users, (batch,), 0, user_size, jnp.int32)
    items = jax.random.randint(k_items, (batch,), 0, item_size, jnp.int32)
    item_ctx = jax.random.uniform(k_ctx, (batch, topic_size), jnp.float32)

    pred = mf_forward(users, items, item_ctx,
                      user_emb_table, item_emb_table, topic_emb)
    pred = jax.block_until_ready(pred)

    ref = reference_forward(users, items, item_ctx,
                            user_emb_table, item_emb_table, topic_emb)
    assert pred.shape == (batch,)
    assert jnp.allclose(pred, ref, atol=1e-3, rtol=1e-3), (pred, ref)

    print("KERNEL_OK")
</pallas_src>

<mosaic_0001>
module attributes {stable_mosaic.version = 11 : i64} {
  func.func @_mf_kernel(%arg0: i32, %arg1: memref<1x128xi32, #tpu.memory_space<vmem>>, %arg2: memref<1x128xi32, #tpu.memory_space<vmem>>, %arg3: memref<8x128xf32, #tpu.memory_space<vmem>>, %arg4: memref<32x16xf32, #tpu.memory_space<vmem>>, %arg5: memref<32x16xf32, #tpu.memory_space<vmem>>, %arg6: memref<32x8xf32, #tpu.memory_space<vmem>>, %arg7: memref<1x128xf32, #tpu.memory_space<vmem>>) attributes {dimension_semantics = [#tpu.dimension_semantics<parallel>], iteration_bounds = array<i64: 1>, scalar_prefetch = 0 : i64, scratch_operands = 0 : i64, tpu.core_type = #tpu.core_type<tc>, window_params = [{transform_indices = @transform_0, window_bounds = array<i64: 1, 128>}, {transform_indices = @transform_1, window_bounds = array<i64: 1, 128>}, {transform_indices = @transform_2, window_bounds = array<i64: 8, 128>}, {pipeline_mode = #tpu.pipeline_mode<synchronous>, transform_indices = @transform_3, window_bounds = array<i64: 32, 16>}, {pipeline_mode = #tpu.pipeline_mode<synchronous>, transform_indices = @transform_4, window_bounds = array<i64: 32, 16>}, {pipeline_mode = #tpu.pipeline_mode<synchronous>, transform_indices = @transform_5, window_bounds = array<i64: 32, 8>}, {transform_indices = @transform_6, window_bounds = array<i64: 1, 128>}]} {
    %c0 = arith.constant 0 : index
    %c0_0 = arith.constant 0 : index
    %0 = vector.load %arg1[%c0, %c0_0] : memref<1x128xi32, #tpu.memory_space<vmem>>, vector<1x128xi32>
    %1 = tpu.iota {dimensions = array<i32: 0>} : vector<16x128xi32>
    %2 = vector.broadcast %0 : vector<1x128xi32> to vector<16x128xi32>
    %3 = arith.cmpi eq, %2, %1 : vector<16x128xi32>
    %4 = arith.extui %3 : vector<16x128xi1> to vector<16x128xi32>
    %5 = arith.sitofp %4 : vector<16x128xi32> to vector<16x128xf32>
    %c0_1 = arith.constant 0 : index
    %c0_2 = arith.constant 0 : index
    %6 = vector.load %arg2[%c0_1, %c0_2] : memref<1x128xi32, #tpu.memory_space<vmem>>, vector<1x128xi32>
    %7 = tpu.iota {dimensions = array<i32: 0>} : vector<16x128xi32>
    %8 = vector.broadcast %6 : vector<1x128xi32> to vector<16x128xi32>
    %9 = arith.cmpi eq, %8, %7 : vector<16x128xi32>
    %10 = arith.extui %9 : vector<16x128xi1> to vector<16x128xi32>
    %11 = arith.sitofp %10 : vector<16x128xi32> to vector<16x128xf32>
    %c0_3 = arith.constant 0 : index
    %c0_4 = arith.constant 0 : index
    %12 = vector.load %arg4[%c0_3, %c0_4] : memref<32x16xf32, #tpu.memory_space<vmem>>, vector<32x16xf32>
    %cst = arith.constant dense<0.000000e+00> : vector<32x128xf32>
    %13 = tpu.matmul %12, %5, %cst {dimension_numbers = #tpu.dot_dimension_numbers<[1], [0], [0], [1], [0, 0, 1, 1], [], []>} : vector<32x16xf32>, vector<16x128xf32>, vector<32x128xf32> -> vector<32x128xf32>
    %c0_5 = arith.constant 0 : index
    %c0_6 = arith.constant 0 : index
    %14 = vector.load %arg5[%c0_5, %c0_6] : memref<32x16xf32, #tpu.memory_space<vmem>>, vector<32x16xf32>
    %cst_7 = arith.constant dense<0.000000e+00> : vector<32x128xf32>
    %15 = tpu.matmul %14, %11, %cst_7 {dimension_numbers = #tpu.dot_dimension_numbers<[1], [0], [0], [1], [0, 0, 1, 1], [], []>} : vector<32x16xf32>, vector<16x128xf32>, vector<32x128xf32> -> vector<32x128xf32>
    %c0_8 = arith.constant 0 : index
    %c0_9 = arith.constant 0 : index
    %16 = vector.load %arg6[%c0_8, %c0_9] : memref<32x8xf32, #tpu.memory_space<vmem>>, vector<32x8xf32>
    %c0_10 = arith.constant 0 : index
    %c0_11 = arith.constant 0 : index
    %17 = vector.load %arg3[%c0_10, %c0_11] : memref<8x128xf32, #tpu.memory_space<vmem>>, vector<8x128xf32>
    %cst_12 = arith.constant dense<0.000000e+00> : vector<32x128xf32>
    %18 = tpu.matmul %16, %17, %cst_12 {dimension_numbers = #tpu.dot_dimension_numbers<[1], [0], [0], [1], [0, 0, 1, 1], [], []>} : vector<32x8xf32>, vector<8x128xf32>, vector<32x128xf32> -> vector<32x128xf32>
    %19 = arith.addf %18, %15 : vector<32x128xf32>
    %20 = arith.mulf %13, %19 : vector<32x128xf32>
    %cst_13 = arith.constant 1.000000e+00 : f32
    %21 = vector.broadcast %cst_13 : f32 to vector<1x32xf32>
    %cst_14 = arith.constant dense<0.000000e+00> : vector<1x128xf32>
    %22 = tpu.matmul %21, %20, %cst_14 {dimension_numbers = #tpu.dot_dimension_numbers<[1], [0], [0], [1], [0, 0, 1, 1], [], []>} : vector<1x32xf32>, vector<32x128xf32>, vector<1x128xf32> -> vector<1x128xf32>
    %c0_15 = arith.constant 0 : index
    %c0_16 = arith.constant 0 : index
    %23 = vector.load %arg7[%c0_15, %c0_16] : memref<1x128xf32, #tpu.memory_space<vmem>>, vector<1x128xf32>
    tpu.vector_store %arg7[%c0_15, %c0_16], %22 {strides = array<i32>} : memref<1x128xf32, #tpu.memory_space<vmem>>, vector<1x128xf32>,
    return
  }
  func.func @transform_0(%arg0: i32) -> (i32, i32) {
    %c0_i32 = arith.constant 0 : i32
    %c0_i32_0 = arith.constant 0 : i32
    return %c0_i32, %arg0 : i32, i32
  }
  func.func @transform_1(%arg0: i32) -> (i32, i32) {
    %c0_i32 = arith.constant 0 : i32
    %c0_i32_0 = arith.constant 0 : i32
    return %c0_i32, %arg0 : i32, i32
  }
  func.func @transform_2(%arg0: i32) -> (i32, i32) {
    %c0_i32 = arith.constant 0 : i32
    %c0_i32_0 = arith.constant 0 : i32
    return %c0_i32, %arg0 : i32, i32
  }
  func.func @transform_3(%arg0: i32) -> (i32, i32) {
    %c0_i32 = arith.constant 0 : i32
    %c0_i32_0 = arith.constant 0 : i32
    %c0_i32_1 = arith.constant 0 : i32
    return %c0_i32, %c0_i32_0 : i32, i32
  }
  func.func @transform_4(%arg0: i32) -> (i32, i32) {
    %c0_i32 = arith.constant 0 : i32
    %c0_i32_0 = arith.constant 0 : i32
    %c0_i32_1 = arith.constant 0 : i32
    return %c0_i32, %c0_i32_0 : i32, i32
  }
  func.func @transform_5(%arg0: i32) -> (i32, i32) {
    %c0_i32 = arith.constant 0 : i32
    %c0_i32_0 = arith.constant 0 : i32
    %c0_i32_1 = arith.constant 0 : i32
    return %c0_i32, %c0_i32_0 : i32, i32
  }
  func.func @transform_6(%arg0: i32) -> (i32, i32) {
    %c0_i32 = arith.constant 0 : i32
    %c0_i32_0 = arith.constant 0 : i32
    return %c0_i32, %arg0 : i32, i32
  }
}

</mosaic_0001>

<bundles_post_ra>
// kernel: mf_forward.1
= control target key start
LH: loop header
LB: loop body
LE: loop exit
PB: predicated region body
PF: predicated region fallthrough
CT: control target
= control target key end

     0   :  { %vm138_vm0 = vcmask 64512   ;;  %v24_v0 = vlaneseq  ;;  %v237_v7 = vmov 1.0   ;;  %vm46_vm5 = vcmask 130048   ;;  %s333_s2 = inlined_call_operand.vmem [shape: f32[8,128], index: 2, kind: input, shape index: {}]   ;;  %s334_s5 = inlined_call_operand.vmem [shape: f32[32,8], index: 5, kind: input, shape index: {}]   ;;  %s335_s1 = inlined_call_operand.vmem [shape: s32[1,128], index: 1, kind: input, shape index: {}]   ;;  %s336_s0 = inlined_call_operand.vmem [shape: s32[1,128], index: 0, kind: input, shape index: {}]   ;;  %s337_s4 = inlined_call_operand.vmem [shape: f32[32,16], index: 4, kind: input, shape index: {}]   ;;  %s338_s3 = inlined_call_operand.vmem [shape: f32[32,16], index: 3, kind: input, shape index: {}]   ;;  %s339_s6 = inlined_call_operand.vmem [shape: f32[1,128], index: 6, kind: output, shape index: {}]  }
   0x1   :  { %v137_v1 = vld [vmem:[%s333_s2] sm:$0xff]  ;;  %v134_v10 = vld [vmem:[%s334_s5 + $0x8] sm:$0xff]  ;;  %v135_v13 = vld [vmem:[%s334_s5 + $0x10] sm:$0xff]  ;;  %vm184_vm6 = vcmask 261120  }
   0x2   :  { %v133_v2 = vld [vmem:[%s334_s5] sm:$0xff]  ;;  %166 = vmatpush.msra.mxu2 %v137_v1  ;;  %v25_v3 = vshrl.u32 %v24_v0, 7  ;;  %v89_v11 = vld [vmem:[%s337_s4 + $0x8] sm:$0xff]  ;;  %v90_v14 = vld [vmem:[%s337_s4 + $0x10] sm:$0xff] }
   0x3   :  { %v235_v4 = vld [vmem:[%s335_s1] ss:$0 sm:$0xff]  ;;  %229 = vmatmul.msk.f32.vlgmr.msra.gmra.mxu2 %vm138_vm0, %v133_v2  ;;  %v43_v12 = vld [vmem:[%s338_s3 + $0x8] sm:$0xff]  ;;  %v44_v15 = vld [vmem:[%s338_s3 + $0x10] sm:$0xff] }
   0x4   :  { %v236_v5 = vld [vmem:[%s336_s0] ss:$0 sm:$0xff]  ;;  %v26_v6 = vadd.s32 8, %v25_v3  ;;  %vm36_vm3 = vcmp.eq.s32.totalorder %v235_v4, %v25_v3  ;;  %v136_v16 = vld [vmem:[%s334_s5 + $0x18] sm:$0xff] }
   0x5   :  { %vm28_vm4 = vcmp.eq.s32.totalorder %v236_v5, %v25_v3  ;;  %v88_v8 = vld [vmem:[%s337_s4] sm:$0xff]  ;;  %v91_v17 = vld [vmem:[%s337_s4 + $0x18] sm:$0xff] }
   0x6   :  { %vm37_vm1 = vcmp.eq.s32.totalorder %v235_v4, %v26_v6  ;;  %vm29_vm2 = vcmp.eq.s32.totalorder %v236_v5, %v26_v6  ;;  %v42_v9 = vld [vmem:[%s338_s3] sm:$0xff]  ;;  %v45_v18 = vld [vmem:[%s338_s3 + $0x18] sm:$0xff] }
   0x7   :  { %223 = vmatpush.msk.msra.mxu1 %vm37_vm1, %v237_v7  ;;  %217 = vmatpush.msk.msra.mxu0 %vm29_vm2, %v237_v7 }
   0x9   :  { %224 = vmatpush.msk.msra.mxu1 %vm36_vm3, %v237_v7  ;;  %218 = vmatpush.msk.msra.mxu0 %vm28_vm4, %v237_v7 }
   0xa   :  { %225 = vmatmul.msk.f32.vlgmr.msra.gmra.mxu1 %vm46_vm5, %v88_v8  ;;  %219 = vmatmul.msk.f32.vlgmr.msra.gmra.mxu0 %vm46_vm5, %v42_v9 }
   0xb   :  { %230 = vmatmul.msk.f32.gmra.mxu2 %vm138_vm0, %v134_v10 }
  0x12   :  { %226 = vmatmul.msk.f32.gmra.mxu1 %vm46_vm5, %v89_v11  ;;  %220 = vmatmul.msk.f32.gmra.mxu0 %vm46_vm5, %v43_v12 }
  0x13   :  { %231 = vmatmul.msk.f32.gmra.mxu2 %vm138_vm0, %v135_v13 }
  0x1a   :  { %227 = vmatmul.msk.f32.gmra.mxu1 %vm46_vm5, %v90_v14  ;;  %221 = vmatmul.msk.f32.gmra.mxu0 %vm46_vm5, %v44_v15 }
  0x1b   :  { %232 = vmatmul.msk.f32.gmra.mxu2 %vm138_vm0, %v136_v16 }
  0x22   :  { %228 = vmatmul.msk.f32.gmra.mxu1 %vm46_vm5, %v91_v17  ;;  %222 = vmatmul.msk.f32.gmra.mxu0 %vm46_vm5, %v45_v18 }
  0x86   :  { %v168_v19 = vpop.f32.mrf.mxu2 }
  0x87   :  { %v121_v20 = vpop.f32.mrf.mxu1  ;;  %v76_v21 = vpop.f32.mrf.mxu0 }
  0x88   :  { %v169_v35 = vadd.f32 %v168_v19, %v121_v20 }
  0x8a   :  { %v180_v38 = vmul.f32 %v169_v35, %v76_v21 }
  0x8e   :  { %v171_v22 = vpop.f32.mrf.mxu2 }
  0x8f   :  { %v124_v23 = vpop.f32.mrf.mxu1  ;;  %v79_v24 = vpop.f32.mrf.mxu0 }
  0x90   :  { %v172_v33 = vadd.f32 %v171_v22, %v124_v23 }
  0x92   :  { %v181_v37 = vmul.f32 %v172_v33, %v79_v24 }
  0x96   :  { %v174_v25 = vpop.f32.mrf.mxu2 }
  0x97   :  { %v127_v26 = vpop.f32.mrf.mxu1  ;;  %v82_v27 = vpop.f32.mrf.mxu0 }
  0x98   :  { %v175_v31 = vadd.f32 %v174_v25, %v127_v26 }
  0x9a   :  { %v182_v36 = vmul.f32 %v175_v31, %v82_v27 }
  0x9e   :  { %v177_v28 = vpop.f32.mrf.mxu2 }
  0x9f   :  { %v130_v29 = vpop.f32.mrf.mxu1  ;;  %v85_v30 = vpop.f32.mrf.mxu0 }
  0xa0   :  { %v178_v32 = vadd.f32 %v177_v28, %v130_v29 }
  0xa2   :  { %v183_v34 = vmul.f32 %v178_v32, %v85_v30 }
  0xa4   :  { %200 = vmatpush.msra.mxu3 %v183_v34 }
  0xa6   :  { %201 = vmatpush.msra.mxu3 %v182_v36 }
  0xa8   :  { %202 = vmatpush.msra.mxu3 %v181_v37 }
  0xaa   :  { %203 = vmatpush.msra.mxu3 %v180_v38 }
  0xab   :  { %233 = vmatmul.msk.f32.vlgmr.msra.gmra.mxu3 %vm184_vm6, %v237_v7 }
 0x12e   :  { %v205_v39 = vpop.f32.mrf.mxu3 }
 0x12f   :  { %208 = vst [vmem:[%s339_s6] sm:$0x1] %v205_v39 }

</bundles_post_ra>
